<compile_context>
chip_gen: v7x
topology: tpu7x:2x2x1
jax: 0.10.0
libtpu: 0.0.40
codegen_flags: <defaults>
</compile_context>

<pallas_src>
import functools

import jax
import jax.numpy as jnp
from jax import lax
from jax.experimental import pallas as pl
from jax.experimental.pallas import tpu as pltpu


def _make_kernel(*, cin, cout, h, w, num_dw):
    hw = h * w
    offsets = [(dy, dx) for dy in (-1, 0, 1) for dx in (-1, 0, 1)]

    def kernel(x_ref, wf_ref, b1_ref, coeff_ref, dwb_ref,
               scale_ref, shift_ref, mask_ref, o_ref):
        x = x_ref[0]                                          # (cin, hw), f32

        # ---- first 3x3 conv, padding=1: single im2col matmul on the MXU ----
        pieces = []
        for k, (dy, dx) in enumerate(offsets):
            s = dy * w + dx
            win = x if s == 0 else pltpu.roll(x, shift=(-s) % hw, axis=1)
            if (dy, dx) != (0, 0):
                win = win * mask_ref[k]                       # zero out-of-image taps
            pieces.append(win)
        stack = jnp.concatenate(pieces, axis=0)               # (9*cin, hw)
        acc = jnp.dot(wf_ref[...],                            # bf16 weights
                      stack.astype(jnp.bfloat16),             # bf16 activations
                      preferred_element_type=jnp.float32)     # (cout, hw) f32 acc
        acc = acc + b1_ref[...]

        # ---- (stacks-1) depthwise 3x3 convs: f32 VPU FMAs, pre-masked taps ----
        for si in range(num_dw):
            y = acc
            acc = y * coeff_ref[si, 4]                        # center tap (dy=dx=0)
            for k, (dy, dx) in enumerate(offsets):
                if (dy, dx) == (0, 0):
                    continue
                s = dy * w + dx
                win = pltpu.roll(y, shift=(-s) % hw, axis=1)
                acc = acc + win * coeff_ref[si, k]            # mask already folded in
            acc = acc + dwb_ref[si]

        # ---- BatchNorm (eval, folded to per-channel scale/shift) + ReLU ----
        out = jnp.maximum(acc * scale_ref[...] + shift_ref[...], 0.0)
        o_ref[0] = out.astype(o_ref.dtype)

    return kernel


@functools.partial(jax.jit, static_argnames=("eps",))
def stack_conv(x, w1, b1, dw_w, dw_b, gamma, beta, run_mean, run_var, *, eps=1e-5):
    """StackConv forward (eval-mode BN).

    x      : (N, Cin, H, W)
    w1     : (Cout, Cin, 3, 3)     first conv weight (PyTorch OIHW)
    b1     : (Cout,)               first conv bias
    dw_w   : (S-1, Cout, 1, 3, 3)  depthwise conv weights
    dw_b   : (S-1, Cout)           depthwise conv biases
    gamma, beta, run_mean, run_var : (Cout,) BatchNorm params / running stats
    returns: (N, Cout, H, W)
    """
    n, cin, h, w = x.shape
    cout = w1.shape[0]
    hw = h * w
    num_dw = dw_w.shape[0]
    s1 = max(num_dw, 1)

    # ---- repack small parameters (tiny, outside the kernel) -----------------
    # First-conv weights -> (Cout, 9*Cin) im2col layout, bf16 (single MXU pass).
    w_flat = (jnp.transpose(w1, (0, 2, 3, 1))
              .reshape(cout, 9 * cin).astype(jnp.bfloat16))
    b1_c = b1.reshape(cout, 1).astype(jnp.float32)

    # 0/1 boundary masks for the 9 taps of a padding=1 3x3 window on flat H*W.
    rows = jnp.arange(h, dtype=jnp.int32)[:, None]
    cols = jnp.arange(w, dtype=jnp.int32)[None, :]
    masks = []
    for dy in (-1, 0, 1):
        for dx in (-1, 0, 1):
            valid = ((rows + dy >= 0) & (rows + dy < h) &
                     (cols + dx >= 0) & (cols + dx < w))
            masks.append(valid.reshape(1, hw))
    masks = jnp.stack(masks, axis=0).astype(jnp.float32)                 # (9, 1, hw)

    # Depthwise taps pre-multiplied by the boundary masks (hoists the per-tap
    # mask multiply out of the VALU-bound depthwise loop).
    if num_dw > 0:
        dww = jnp.transpose(dw_w.reshape(num_dw, cout, 9), (0, 2, 1))    # (S-1, 9, Cout)
        dw_coeff = (dww.astype(jnp.float32)[:, :, :, None]
                    * masks[None, :, :, :])                              # (S-1, 9, Cout, hw)
        dwb = dw_b.reshape(num_dw, cout, 1).astype(jnp.float32)
    else:  # dummies; the kernel's depthwise loop is empty when num_dw == 0
        dw_coeff = jnp.zeros((1, 9, cout, hw), jnp.float32)
        dwb = jnp.zeros((1, cout, 1), jnp.float32)

    inv = lax.rsqrt(run_var.astype(jnp.float32) + eps)
    g32 = gamma.astype(jnp.float32)
    bn_scale = (g32 * inv).reshape(cout, 1)
    bn_shift = (beta.astype(jnp.float32)
                - run_mean.astype(jnp.float32) * g32 * inv).reshape(cout, 1)

    x_flat = x.reshape(n, cin, hw)     # free reshape; stays NCHW, H*W on lanes

    # ---- generation-aware VMEM budget (v5e/v6e 128 MiB, v7x 64 MiB) ---------
    try:
        vmem_cap = int(pltpu.get_tpu_info().vmem_capacity_bytes)
    except Exception:
        vmem_cap = 64 << 20
    f32b = 4
    in_blk = cin * hw * f32b
    out_blk = cout * hw * f32b
    param_bytes = (9 * cin * cout * 2                       # bf16 im2col weights
                   + (3 * cout + s1 * cout) * f32b          # biases + BN scale/shift
                   + s1 * 9 * cout * hw * f32b              # depthwise coefficients
                   + 9 * hw * f32b)                         # boundary masks
    temp_bytes = (9 * cin + 6 * cout) * hw * f32b           # im2col stack + acc/y slack
    need = 2 * (in_blk + out_blk + param_bytes) + temp_bytes + (4 << 20)
    cap = max(vmem_cap // 2, 16 << 20)
    vmem_limit = int(min(max(need, 16 << 20), cap))

    kernel = _make_kernel(cin=cin, cout=cout, h=h, w=w, num_dw=num_dw)

    out_flat = pl.pallas_call(
        kernel,
        out_shape=jax.ShapeDtypeStruct((n, cout, hw), x.dtype),
        grid_spec=pltpu.PrefetchScalarGridSpec(
            num_scalar_prefetch=0,
            grid=(n,),          # one image / step; >=2 parallel steps feed both v7x cores
            in_specs=[
                pl.BlockSpec((1, cin, hw), lambda i: (i, 0, 0)),          # x image
                pl.BlockSpec((cout, 9 * cin), lambda i: (0, 0)),          # conv1 W (im2col)
                pl.BlockSpec((cout, 1), lambda i: (0, 0)),                # conv1 bias
                pl.BlockSpec((s1, 9, cout, hw), lambda i: (0, 0, 0, 0)),  # dw mask*tap coeffs
                pl.BlockSpec((s1, cout, 1), lambda i: (0, 0, 0)),         # dw bias
                pl.BlockSpec((cout, 1), lambda i: (0, 0)),                # BN scale
                pl.BlockSpec((cout, 1), lambda i: (0, 0)),                # BN shift
                pl.BlockSpec((9, 1, hw), lambda i: (0, 0, 0)),            # boundary masks
            ],
            out_specs=pl.BlockSpec((1, cout, hw), lambda i: (i, 0, 0)),
        ),
        compiler_params=pltpu.CompilerParams(
            dimension_semantics=("parallel",),
            vmem_limit_bytes=vmem_limit,
        ),
    )(x_flat, w_flat, b1_c, dw_coeff, dwb, bn_scale, bn_shift, masks)

    return out_flat.reshape(n, cout, h, w)


if __name__ == "__main__":
    key = jax.random.PRNGKey(0)
    ks = jax.random.split(key, 9)

    N, CIN, COUT, H, W = 2, 4, 8, 16, 16
    STACKS = 2
    EPS = 1e-5

    x = jax.random.normal(ks[0], (N, CIN, H, W), dtype=jnp.float32)
    w1 = jax.random.normal(ks[1], (COUT, CIN, 3, 3), dtype=jnp.float32) * 0.2
    b1 = jax.random.normal(ks[2], (COUT,), dtype=jnp.float32) * 0.1
    dw_w = jax.random.normal(ks[3], (STACKS - 1, COUT, 1, 3, 3), dtype=jnp.float32) * 0.2
    dw_b = jax.random.normal(ks[4], (STACKS - 1, COUT), dtype=jnp.float32) * 0.1
    gamma = 1.0 + 0.1 * jax.random.normal(ks[5], (COUT,), dtype=jnp.float32)
    beta = 0.1 * jax.random.normal(ks[6], (COUT,), dtype=jnp.float32)
    run_mean = 0.1 * jax.random.normal(ks[7], (COUT,), dtype=jnp.float32)
    run_var = jnp.abs(1.0 + 0.1 * jax.random.normal(ks[8], (COUT,), dtype=jnp.float32))

    out = stack_conv(x, w1, b1, dw_w, dw_b, gamma, beta, run_mean, run_var, eps=EPS)
    out = jax.block_until_ready(out)

    # ---- pure-JAX reference ------------------------------------------------
    # First conv uses bf16-quantized operands (exactly like the kernel's
    # single-pass bf16 MXU matmul); accumulation and everything else in f32.
    dn = ("NCHW", "OIHW", "NCHW")
    x_q = x.astype(jnp.bfloat16).astype(jnp.float32)
    w1_q = w1.astype(jnp.bfloat16).astype(jnp.float32)
    y = lax.conv_general_dilated(x_q, w1_q, (1, 1), "SAME", dimension_numbers=dn,
                                 precision=lax.Precision.HIGHEST)
    y = y + b1[None, :, None, None]
    for s in range(STACKS - 1):
        y = lax.conv_general_dilated(y, dw_w[s], (1, 1), "SAME",
                                     dimension_numbers=dn,
                                     feature_group_count=COUT,
                                     precision=lax.Precision.HIGHEST)
        y = y + dw_b[s][None, :, None, None]
    y = (gamma[None, :, None, None] * (y - run_mean[None, :, None, None])
         * lax.rsqrt(run_var + EPS)[None, :, None, None] + beta[None, :, None, None])
    ref = jnp.maximum(y, 0.0)

    assert out.shape == (N, COUT, H, W)
    err = float(jnp.max(jnp.abs(out - ref)))
    assert jnp.allclose(out, ref, atol=5e-4, rtol=5e-4), f"max abs err = {err}"

    print("KERNEL_OK")
</pallas_src>

<mosaic_0001>
module attributes {stable_mosaic.version = 11 : i64} {
  func.func @kernel(%arg0: i32, %arg1: memref<1x4x256xf32, #tpu.memory_space<vmem>>, %arg2: memref<8x36xbf16, #tpu.memory_space<vmem>>, %arg3: memref<8x1xf32, #tpu.memory_space<vmem>>, %arg4: memref<1x9x8x256xf32, #tpu.memory_space<vmem>>, %arg5: memref<1x8x1xf32, #tpu.memory_space<vmem>>, %arg6: memref<8x1xf32, #tpu.memory_space<vmem>>, %arg7: memref<8x1xf32, #tpu.memory_space<vmem>>, %arg8: memref<9x1x256xf32, #tpu.memory_space<vmem>>, %arg9: memref<1x8x256xf32, #tpu.memory_space<vmem>>) attributes {dimension_semantics = [#tpu.dimension_semantics<parallel>], iteration_bounds = array<i64: 2>, scalar_prefetch = 0 : i64, scratch_operands = 0 : i64, tpu.core_type = #tpu.core_type<tc>, window_params = [{transform_indices = @transform_0, window_bounds = array<i64: 1, 4, 256>}, {pipeline_mode = #tpu.pipeline_mode<synchronous>, transform_indices = @transform_1, window_bounds = array<i64: 8, 36>}, {pipeline_mode = #tpu.pipeline_mode<synchronous>, transform_indices = @transform_2, window_bounds = array<i64: 8, 1>}, {pipeline_mode = #tpu.pipeline_mode<synchronous>, transform_indices = @transform_3, window_bounds = array<i64: 1, 9, 8, 256>}, {pipeline_mode = #tpu.pipeline_mode<synchronous>, transform_indices = @transform_4, window_bounds = array<i64: 1, 8, 1>}, {pipeline_mode = #tpu.pipeline_mode<synchronous>, transform_indices = @transform_5, window_bounds = array<i64: 8, 1>}, {pipeline_mode = #tpu.pipeline_mode<synchronous>, transform_indices = @transform_6, window_bounds = array<i64: 8, 1>}, {pipeline_mode = #tpu.pipeline_mode<synchronous>, transform_indices = @transform_7, window_bounds = array<i64: 9, 1, 256>}, {transform_indices = @transform_8, window_bounds = array<i64: 1, 8, 256>}]} {
    %c0 = arith.constant 0 : index
    %c0_0 = arith.constant 0 : index
    %c0_1 = arith.constant 0 : index
    %0 = vector.load %arg1[%c0, %c0_0, %c0_1] : memref<1x4x256xf32, #tpu.memory_space<vmem>>, vector<1x4x256xf32>
    %1 = vector.shape_cast %0 : vector<1x4x256xf32> to vector<4x256xf32>
    %c17_i32 = arith.constant 17 : i32
    %2 = tpu.dynamic_rotate %1 by %c17_i32 dim 1 : vector<4x256xf32>, i32 -> vector<4x256xf32>
    %c0_2 = arith.constant 0 : index
    %c0_3 = arith.constant 0 : index
    %c0_4 = arith.constant 0 : index
    %3 = vector.load %arg8[%c0_2, %c0_3, %c0_4] : memref<9x1x256xf32, #tpu.memory_space<vmem>>, vector<1x1x256xf32>
    %4 = vector.shape_cast %3 : vector<1x1x256xf32> to vector<1x256xf32>
    %5 = vector.broadcast %4 : vector<1x256xf32> to vector<4x256xf32>
    %6 = arith.mulf %2, %5 : vector<4x256xf32>
    %c16_i32 = arith.constant 16 : i32
    %7 = tpu.dynamic_rotate %1 by %c16_i32 dim 1 : vector<4x256xf32>, i32 -> vector<4x256xf32>
    %c1 = arith.constant 1 : index
    %c0_5 = arith.constant 0 : index
    %c0_6 = arith.constant 0 : index
    %8 = vector.load %arg8[%c1, %c0_5, %c0_6] : memref<9x1x256xf32, #tpu.memory_space<vmem>>, vector<1x1x256xf32>
    %9 = vector.shape_cast %8 : vector<1x1x256xf32> to vector<1x256xf32>
    %10 = vector.broadcast %9 : vector<1x256xf32> to vector<4x256xf32>
    %11 = arith.mulf %7, %10 : vector<4x256xf32>
    %c15_i32 = arith.constant 15 : i32
    %12 = tpu.dynamic_rotate %1 by %c15_i32 dim 1 : vector<4x256xf32>, i32 -> vector<4x256xf32>
    %c2 = arith.constant 2 : index
    %c0_7 = arith.constant 0 : index
    %c0_8 = arith.constant 0 : index
    %13 = vector.load %arg8[%c2, %c0_7, %c0_8] : memref<9x1x256xf32, #tpu.memory_space<vmem>>, vector<1x1x256xf32>
    %14 = vector.shape_cast %13 : vector<1x1x256xf32> to vector<1x256xf32>
    %15 = vector.broadcast %14 : vector<1x256xf32> to vector<4x256xf32>
    %16 = arith.mulf %12, %15 : vector<4x256xf32>
    %c1_i32 = arith.constant 1 : i32
    %17 = tpu.dynamic_rotate %1 by %c1_i32 dim 1 : vector<4x256xf32>, i32 -> vector<4x256xf32>
    %c3 = arith.constant 3 : index
    %c0_9 = arith.constant 0 : index
    %c0_10 = arith.constant 0 : index
    %18 = vector.load %arg8[%c3, %c0_9, %c0_10] : memref<9x1x256xf32, #tpu.memory_space<vmem>>, vector<1x1x256xf32>
    %19 = vector.shape_cast %18 : vector<1x1x256xf32> to vector<1x256xf32>
    %20 = vector.broadcast %19 : vector<1x256xf32> to vector<4x256xf32>
    %21 = arith.mulf %17, %20 : vector<4x256xf32>
    %c255_i32 = arith.constant 255 : i32
    %22 = tpu.dynamic_rotate %1 by %c255_i32 dim 1 : vector<4x256xf32>, i32 -> vector<4x256xf32>
    %c5 = arith.constant 5 : index
    %c0_11 = arith.constant 0 : index
    %c0_12 = arith.constant 0 : index
    %23 = vector.load %arg8[%c5, %c0_11, %c0_12] : memref<9x1x256xf32, #tpu.memory_space<vmem>>, vector<1x1x256xf32>
    %24 = vector.shape_cast %23 : vector<1x1x256xf32> to vector<1x256xf32>
    %25 = vector.broadcast %24 : vector<1x256xf32> to vector<4x256xf32>
    %26 = arith.mulf %22, %25 : vector<4x256xf32>
    %c241_i32 = arith.constant 241 : i32
    %27 = tpu.dynamic_rotate %1 by %c241_i32 dim 1 : vector<4x256xf32>, i32 -> vector<4x256xf32>
    %c6 = arith.constant 6 : index
    %c0_13 = arith.constant 0 : index
    %c0_14 = arith.constant 0 : index
    %28 = vector.load %arg8[%c6, %c0_13, %c0_14] : memref<9x1x256xf32, #tpu.memory_space<vmem>>, vector<1x1x256xf32>
    %29 = vector.shape_cast %28 : vector<1x1x256xf32> to vector<1x256xf32>
    %30 = vector.broadcast %29 : vector<1x256xf32> to vector<4x256xf32>
    %31 = arith.mulf %27, %30 : vector<4x256xf32>
    %c240_i32 = arith.constant 240 : i32
    %32 = tpu.dynamic_rotate %1 by %c240_i32 dim 1 : vector<4x256xf32>, i32 -> vector<4x256xf32>
    %c7 = arith.constant 7 : index
    %c0_15 = arith.constant 0 : index
    %c0_16 = arith.constant 0 : index
    %33 = vector.load %arg8[%c7, %c0_15, %c0_16] : memref<9x1x256xf32, #tpu.memory_space<vmem>>, vector<1x1x256xf32>
    %34 = vector.shape_cast %33 : vector<1x1x256xf32> to vector<1x256xf32>
    %35 = vector.broadcast %34 : vector<1x256xf32> to vector<4x256xf32>
    %36 = arith.mulf %32, %35 : vector<4x256xf32>
    %c239_i32 = arith.constant 239 : i32
    %37 = tpu.dynamic_rotate %1 by %c239_i32 dim 1 : vector<4x256xf32>, i32 -> vector<4x256xf32>
    %c8 = arith.constant 8 : index
    %c0_17 = arith.constant 0 : index
    %c0_18 = arith.constant 0 : index
    %38 = vector.load %arg8[%c8, %c0_17, %c0_18] : memref<9x1x256xf32, #tpu.memory_space<vmem>>, vector<1x1x256xf32>
    %39 = vector.shape_cast %38 : vector<1x1x256xf32> to vector<1x256xf32>
    %40 = vector.broadcast %39 : vector<1x256xf32> to vector<4x256xf32>
    %41 = arith.mulf %37, %40 : vector<4x256xf32>
    %42 = tpu.concatenate %6, %11, %16, %21, %1, %26, %31, %36, %41 in 0 : vector<4x256xf32>, vector<4x256xf32>, vector<4x256xf32>, vector<4x256xf32>, vector<4x256xf32>, vector<4x256xf32>, vector<4x256xf32>, vector<4x256xf32>, vector<4x256xf32> -> vector<36x256xf32>
    %c0_19 = arith.constant 0 : index
    %c0_20 = arith.constant 0 : index
    %43 = vector.load %arg2[%c0_19, %c0_20] : memref<8x36xbf16, #tpu.memory_space<vmem>>, vector<8x36xbf16>
    %44 = arith.truncf %42 : vector<36x256xf32> to vector<36x256xbf16>
    %cst = arith.constant dense<0.000000e+00> : vector<8x256xf32>
    %45 = tpu.matmul %43, %44, %cst {dimension_numbers = #tpu.dot_dimension_numbers<[1], [0], [0], [1], [0, 0, 1, 1], [], []>} : vector<8x36xbf16>, vector<36x256xbf16>, vector<8x256xf32> -> vector<8x256xf32>
    %c0_21 = arith.constant 0 : index
    %c0_22 = arith.constant 0 : index
    %46 = vector.load %arg3[%c0_21, %c0_22] : memref<8x1xf32, #tpu.memory_space<vmem>>, vector<8x1xf32>
    %47 = vector.broadcast %46 : vector<8x1xf32> to vector<8x256xf32>
    %48 = arith.addf %45, %47 : vector<8x256xf32>
    %c0_23 = arith.constant 0 : index
    %c4 = arith.constant 4 : index
    %c0_24 = arith.constant 0 : index
    %c0_25 = arith.constant 0 : index
    %49 = vector.load %arg4[%c0_23, %c4, %c0_24, %c0_25] : memref<1x9x8x256xf32, #tpu.memory_space<vmem>>, vector<1x1x8x256xf32>
    %50 = vector.shape_cast %49 : vector<1x1x8x256xf32> to vector<8x256xf32>
    %51 = arith.mulf %48, %50 : vector<8x256xf32>
    %c17_i32_26 = arith.constant 17 : i32
    %52 = tpu.dynamic_rotate %48 by %c17_i32_26 dim 1 : vector<8x256xf32>, i32 -> vector<8x256xf32>
    %c0_27 = arith.constant 0 : index
    %c0_28 = arith.constant 0 : index
    %c0_29 = arith.constant 0 : index
    %c0_30 = arith.constant 0 : index
    %53 = vector.load %arg4[%c0_27, %c0_28, %c0_29, %c0_30] : memref<1x9x8x256xf32, #tpu.memory_space<vmem>>, vector<1x1x8x256xf32>
    %54 = vector.shape_cast %53 : vector<1x1x8x256xf32> to vector<8x256xf32>
    %55 = arith.mulf %52, %54 : vector<8x256xf32>
    %56 = arith.addf %51, %55 : vector<8x256xf32>
    %c16_i32_31 = arith.constant 16 : i32
    %57 = tpu.dynamic_rotate %48 by %c16_i32_31 dim 1 : vector<8x256xf32>, i32 -> vector<8x256xf32>
    %c0_32 = arith.constant 0 : index
    %c1_33 = arith.constant 1 : index
    %c0_34 = arith.constant 0 : index
    %c0_35 = arith.constant 0 : index
    %58 = vector.load %arg4[%c0_32, %c1_33, %c0_34, %c0_35] : memref<1x9x8x256xf32, #tpu.memory_space<vmem>>, vector<1x1x8x256xf32>
    %59 = vector.shape_cast %58 : vector<1x1x8x256xf32> to vector<8x256xf32>
    %60 = arith.mulf %57, %59 : vector<8x256xf32>
    %61 = arith.addf %56, %60 : vector<8x256xf32>
    %c15_i32_36 = arith.constant 15 : i32
    %62 = tpu.dynamic_rotate %48 by %c15_i32_36 dim 1 : vector<8x256xf32>, i32 -> vector<8x256xf32>
    %c0_37 = arith.constant 0 : index
    %c2_38 = arith.constant 2 : index
    %c0_39 = arith.constant 0 : index
    %c0_40 = arith.constant 0 : index
    %63 = vector.load %arg4[%c0_37, %c2_38, %c0_39, %c0_40] : memref<1x9x8x256xf32, #tpu.memory_space<vmem>>, vector<1x1x8x256xf32>
    %64 = vector.shape_cast %63 : vector<1x1x8x256xf32> to vector<8x256xf32>
    %65 = arith.mulf %62, %64 : vector<8x256xf32>
    %66 = arith.addf %61, %65 : vector<8x256xf32>
    %c1_i32_41 = arith.constant 1 : i32
    %67 = tpu.dynamic_rotate %48 by %c1_i32_41 dim 1 : vector<8x256xf32>, i32 -> vector<8x256xf32>
    %c0_42 = arith.constant 0 : index
    %c3_43 = arith.constant 3 : index
    %c0_44 = arith.constant 0 : index
    %c0_45 = arith.constant 0 : index
    %68 = vector.load %arg4[%c0_42, %c3_43, %c0_44, %c0_45] : memref<1x9x8x256xf32, #tpu.memory_space<vmem>>, vector<1x1x8x256xf32>
    %69 = vector.shape_cast %68 : vector<1x1x8x256xf32> to vector<8x256xf32>
    %70 = arith.mulf %67, %69 : vector<8x256xf32>
    %71 = arith.addf %66, %70 : vector<8x256xf32>
    %c255_i32_46 = arith.constant 255 : i32
    %72 = tpu.dynamic_rotate %48 by %c255_i32_46 dim 1 : vector<8x256xf32>, i32 -> vector<8x256xf32>
    %c0_47 = arith.constant 0 : index
    %c5_48 = arith.constant 5 : index
    %c0_49 = arith.constant 0 : index
    %c0_50 = arith.constant 0 : index
    %73 = vector.load %arg4[%c0_47, %c5_48, %c0_49, %c0_50] : memref<1x9x8x256xf32, #tpu.memory_space<vmem>>, vector<1x1x8x256xf32>
    %74 = vector.shape_cast %73 : vector<1x1x8x256xf32> to vector<8x256xf32>
    %75 = arith.mulf %72, %74 : vector<8x256xf32>
    %76 = arith.addf %71, %75 : vector<8x256xf32>
    %c241_i32_51 = arith.constant 241 : i32
    %77 = tpu.dynamic_rotate %48 by %c241_i32_51 dim 1 : vector<8x256xf32>, i32 -> vector<8x256xf32>
    %c0_52 = arith.constant 0 : index
    %c6_53 = arith.constant 6 : index
    %c0_54 = arith.constant 0 : index
    %c0_55 = arith.constant 0 : index
    %78 = vector.load %arg4[%c0_52, %c6_53, %c0_54, %c0_55] : memref<1x9x8x256xf32, #tpu.memory_space<vmem>>, vector<1x1x8x256xf32>
    %79 = vector.shape_cast %78 : vector<1x1x8x256xf32> to vector<8x256xf32>
    %80 = arith.mulf %77, %79 : vector<8x256xf32>
    %81 = arith.addf %76, %80 : vector<8x256xf32>
    %c240_i32_56 = arith.constant 240 : i32
    %82 = tpu.dynamic_rotate %48 by %c240_i32_56 dim 1 : vector<8x256xf32>, i32 -> vector<8x256xf32>
    %c0_57 = arith.constant 0 : index
    %c7_58 = arith.constant 7 : index
    %c0_59 = arith.constant 0 : index
    %c0_60 = arith.constant 0 : index
    %83 = vector.load %arg4[%c0_57, %c7_58, %c0_59, %c0_60] : memref<1x9x8x256xf32, #tpu.memory_space<vmem>>, vector<1x1x8x256xf32>
    %84 = vector.shape_cast %83 : vector<1x1x8x256xf32> to vector<8x256xf32>
    %85 = arith.mulf %82, %84 : vector<8x256xf32>
    %86 = arith.addf %81, %85 : vector<8x256xf32>
    %c239_i32_61 = arith.constant 239 : i32
    %87 = tpu.dynamic_rotate %48 by %c239_i32_61 dim 1 : vector<8x256xf32>, i32 -> vector<8x256xf32>
    %c0_62 = arith.constant 0 : index
    %c8_63 = arith.constant 8 : index
    %c0_64 = arith.constant 0 : index
    %c0_65 = arith.constant 0 : index
    %88 = vector.load %arg4[%c0_62, %c8_63, %c0_64, %c0_65] : memref<1x9x8x256xf32, #tpu.memory_space<vmem>>, vector<1x1x8x256xf32>
    %89 = vector.shape_cast %88 : vector<1x1x8x256xf32> to vector<8x256xf32>
    %90 = arith.mulf %87, %89 : vector<8x256xf32>
    %91 = arith.addf %86, %90 : vector<8x256xf32>
    %c0_66 = arith.constant 0 : index
    %c0_67 = arith.constant 0 : index
    %c0_68 = arith.constant 0 : index
    %92 = vector.load %arg5[%c0_66, %c0_67, %c0_68] : memref<1x8x1xf32, #tpu.memory_space<vmem>>, vector<1x8x1xf32>
    %93 = vector.shape_cast %92 : vector<1x8x1xf32> to vector<8x1xf32>
    %94 = vector.broadcast %93 : vector<8x1xf32> to vector<8x256xf32>
    %95 = arith.addf %91, %94 : vector<8x256xf32>
    %c0_69 = arith.constant 0 : index
    %c0_70 = arith.constant 0 : index
    %96 = vector.load %arg6[%c0_69, %c0_70] : memref<8x1xf32, #tpu.memory_space<vmem>>, vector<8x1xf32>
    %97 = vector.broadcast %96 : vector<8x1xf32> to vector<8x256xf32>
    %98 = arith.mulf %95, %97 : vector<8x256xf32>
    %c0_71 = arith.constant 0 : index
    %c0_72 = arith.constant 0 : index
    %99 = vector.load %arg7[%c0_71, %c0_72] : memref<8x1xf32, #tpu.memory_space<vmem>>, vector<8x1xf32>
    %100 = vector.broadcast %99 : vector<8x1xf32> to vector<8x256xf32>
    %101 = arith.addf %98, %100 : vector<8x256xf32>
    %cst_73 = arith.constant 0.000000e+00 : f32
    %102 = vector.broadcast %cst_73 : f32 to vector<8x256xf32>
    %103 = arith.maximumf %101, %102 : vector<8x256xf32>
    %c0_74 = arith.constant 0 : index
    %c0_75 = arith.constant 0 : index
    %c0_76 = arith.constant 0 : index
    %104 = vector.load %arg9[%c0_74, %c0_75, %c0_76] : memref<1x8x256xf32, #tpu.memory_space<vmem>>, vector<1x8x256xf32>
    %105 = vector.shape_cast %104 : vector<1x8x256xf32> to vector<8x256xf32>
    %106 = vector.shape_cast %103 : vector<8x256xf32> to vector<1x8x256xf32>
    tpu.vector_store %arg9[%c0_74, %c0_75, %c0_76], %106 {strides = array<i32>} : memref<1x8x256xf32, #tpu.memory_space<vmem>>, vector<1x8x256xf32>,
    return
  }
  func.func @transform_0(%arg0: i32) -> (i32, i32, i32) {
    %c0_i32 = arith.constant 0 : i32
    %c0_i32_0 = arith.constant 0 : i32
    %c0_i32_1 = arith.constant 0 : i32
    return %arg0, %c0_i32, %c0_i32_0 : i32, i32, i32
  }
  func.func @transform_1(%arg0: i32) -> (i32, i32) {
    %c0_i32 = arith.constant 0 : i32
    %c0_i32_0 = arith.constant 0 : i32
    %c0_i32_1 = arith.constant 0 : i32
    return %c0_i32, %c0_i32_0 : i32, i32
  }
  func.func @transform_2(%arg0: i32) -> (i32, i32) {
    %c0_i32 = arith.constant 0 : i32
    %c0_i32_0 = arith.constant 0 : i32
    %c0_i32_1 = arith.constant 0 : i32
    return %c0_i32, %c0_i32_0 : i32, i32
  }
  func.func @transform_3(%arg0: i32) -> (i32, i32, i32, i32) {
    %c0_i32 = arith.constant 0 : i32
    %c0_i32_0 = arith.constant 0 : i32
    %c0_i32_1 = arith.constant 0 : i32
    %c0_i32_2 = arith.constant 0 : i32
    %c0_i32_3 = arith.constant 0 : i32
    return %c0_i32, %c0_i32_0, %c0_i32_1, %c0_i32_2 : i32, i32, i32, i32
  }
  func.func @transform_4(%arg0: i32) -> (i32, i32, i32) {
    %c0_i32 = arith.constant 0 : i32
    %c0_i32_0 = arith.constant 0 : i32
    %c0_i32_1 = arith.constant 0 : i32
    %c0_i32_2 = arith.constant 0 : i32
    return %c0_i32, %c0_i32_0, %c0_i32_1 : i32, i32, i32
  }
  func.func @transform_5(%arg0: i32) -> (i32, i32) {
    %c0_i32 = arith.constant 0 : i32
    %c0_i32_0 = arith.constant 0 : i32
    %c0_i32_1 = arith.constant 0 : i32
    return %c0_i32, %c0_i32_0 : i32, i32
  }
  func.func @transform_6(%arg0: i32) -> (i32, i32) {
    %c0_i32 = arith.constant 0 : i32
    %c0_i32_0 = arith.constant 0 : i32
    %c0_i32_1 = arith.constant 0 : i32
    return %c0_i32, %c0_i32_0 : i32, i32
  }
  func.func @transform_7(%arg0: i32) -> (i32, i32, i32) {
    %c0_i32 = arith.constant 0 : i32
    %c0_i32_0 = arith.constant 0 : i32
    %c0_i32_1 = arith.constant 0 : i32
    %c0_i32_2 = arith.constant 0 : i32
    return %c0_i32, %c0_i32_0, %c0_i32_1 : i32, i32, i32
  }
  func.func @transform_8(%arg0: i32) -> (i32, i32, i32) {
    %c0_i32 = arith.constant 0 : i32
    %c0_i32_0 = arith.constant 0 : i32
    %c0_i32_1 = arith.constant 0 : i32
    return %arg0, %c0_i32, %c0_i32_0 : i32, i32, i32
  }
}

</mosaic_0001>

<bundles_post_ra>
// kernel: stack_conv.1
= control target key start
LH: loop header
LB: loop body
LE: loop exit
PB: predicated region body
PF: predicated region fallthrough
CT: control target
= control target key end

     0   :  { %s897_s27 = smov 0   ;;  %s1177_s0 = inlined_call_operand.vmem [shape: f32[2,4,256], index: 0, kind: input, shape index: {}]   ;;  %s1178_s1 = inlined_call_operand.vmem [shape: bf16[8,36], index: 1, kind: input, shape index: {}]   ;;  %s1179_s2 = inlined_call_operand.vmem [shape: f32[8,1], index: 2, kind: input, shape index: {}]   ;;  %s1180_s3 = inlined_call_operand.vmem [shape: f32[1,9,8,256], index: 3, kind: input, shape index: {}]   ;;  %s1181_s4 = inlined_call_operand.vmem [shape: f32[1,8,1], index: 4, kind: input, shape index: {}]   ;;  %s1182_s5 = inlined_call_operand.vmem [shape: f32[8,1], index: 5, kind: input, shape index: {}]   ;;  %s1183_s6 = inlined_call_operand.vmem [shape: f32[8,1], index: 6, kind: input, shape index: {}]   ;;  %s1184_s7 = inlined_call_operand.vmem [shape: f32[9,1,256], index: 7, kind: input, shape index: {}]   ;;  %s1185_s8 = inlined_call_operand.vmem [shape: f32[2,8,256], index: 8, kind: output, shape index: {}]  }
   0x1 LB: > { %s777_s28 = sadd.s32 4294967295, %s841_s27   ;;  %p781_p0 = scmp.ge.s32.totalorder %s841_s27, 1  ;;  %s841_s27 = sphi %s897_s27, %s18_s27  }
   0x2   : > { %p262_p1 = scmp.lt.s32.totalorder %s841_s27, 3 }
   0x4   : > { %p263_p2 = pnand %p781_p0, %p262_p1 }
   0x5   : > { %p296_p3 = scmp.lt.s32.totalorder (!%p263_p2), %s777_s28, 1  ;;  %s843_s11 = smov (!%p263_p2), 1   ;;  %v849_v2 = vmov (!%p263_p2), 0   ;;  %v528_v3 = vld [vmem:[%s1179_s2] sm:$0xff] (!%p263_p2)  ;;  %v315_v5 = vlaneseq (!%p263_p2)  ;;  %v789_v42 = vld [vmem:[%s1184_s7 + $0xa] sm:$0x3] (!%p263_p2) }
   0x6   : > { %266 = sbr.rel (%p263_p2) target bundleno = 555 (0x22b), region = 52  ;;  %s844_s12 = smov (!%p263_p2), 16   ;;  %577 = vmatprep.mubr.bf16.mxu0 (!%p263_p2), %v849_v2  ;;  %832 = vset.pattern.permute.xlu0 (!%p263_p2), %v849_v2  ;;  %v694_v4 = vld [vmem:[%s1181_s4] sm:$0xff] (!%p263_p2)  ;;  %vm512_vm5 = vcmask (!%p263_p2), 1043456   ;;  %v791_v53 = vld [vmem:[%s1184_s7 + $0xe] sm:$0x3] (!%p263_p2) }
   0x7   : > { %s845_s13 = smov (!%p263_p2), 17   ;;  %s846_s14 = smov (!%p263_p2), 15   ;;  %833 = vset.pattern.permute.xlu1 (!%p263_p2), %v849_v2  ;;  %v323_v6 = vshrl.u32 (!%p263_p2), %v315_v5, 7  ;;  %v955_v7 = vand.u32 (!%p263_p2), 127, %v315_v5  ;;  %v788_v12 = vld [vmem:[%s1184_s7 + $0x6] sm:$0x3] (!%p263_p2) }
   0x8   : > { %s847_s15 = smov (!%p263_p2), 127   ;;  %s848_s16 = smov (!%p263_p2), 112   ;;  %v786_v13 = vld [vmem:[%s1184_s7 + $0x2] sm:$0x3] (!%p263_p2)  ;;  %v320_v18 = vld [vmem:[%s1184_s7] sm:$0x3] (!%p263_p2) }
   0x9   : > { %s850_s17 = smov (!%p263_p2), 113   ;;  %s851_s18 = smov (!%p263_p2), 111   ;;  %v957_v10 = vsub.s32 (!%p263_p2), 0, %v323_v6  ;;  %v959_v11 = vsub.s32 (!%p263_p2), 1, %v323_v6  ;;  %vm382_vm0 = vcmp.lt.s32.totalorder (!%p263_p2), %v955_v7, 1  ;;  %vm338_vm1 = vcmp.lt.s32.totalorder (!%p263_p2), %v955_v7, 16 }
   0xa   : > { %v787_v23 = vld [vmem:[%s1184_s7 + $0x4] sm:$0x3] (!%p263_p2)  ;;  %vm317_vm2 = vcmp.lt.s32.totalorder (!%p263_p2), %v955_v7, 17  ;;  %vm360_vm3 = vcmp.lt.s32.totalorder (!%p263_p2), %v955_v7, 15  ;;  %vm404_vm4 = vcmp.lt.s32.totalorder (!%p263_p2), %v955_v7, 127  ;;  %vm448_vm6 = vcmp.lt.s32.totalorder (!%p263_p2), %v955_v7, 112 }
   0xb   : > { %v391_v16 = vrot.slane (!%p263_p2), %v788_v12, %v957_v10  ;;  %v395_v17 = vrot.slane (!%p263_p2), %v788_v12, %v959_v11  ;;  %v347_v21 = vrot.slane (!%p263_p2), %v786_v13, %v957_v10  ;;  %v351_v22 = vrot.slane (!%p263_p2), %v786_v13, %v959_v11 }
   0xc   : > { %v325_v24 = vrot.slane (!%p263_p2), %v320_v18, %v957_v10  ;;  %v329_v25 = vrot.slane (!%p263_p2), %v320_v18, %v959_v11  ;;  %v369_v34 = vrot.slane (!%p263_p2), %v787_v23, %v957_v10  ;;  %v373_v35 = vrot.slane (!%p263_p2), %v787_v23, %v959_v11  ;;  %v792_v18 = vld [vmem:[%s1184_s7 + $0x10] sm:$0x3] (!%p263_p2) }
   0xd   : > { %s1187_s28 = smov (!%p296_p3, %s777_s28), 1  ;;  %v413_v51 = vrot.slane %v789_v42, %v957_v10  ;;  %v417_v52 = vrot.slane %v789_v42, %v959_v11  ;;  %v457_v2 = vrot.slane %v791_v53, %v957_v10  ;;  %vm426_vm7 = vcmp.lt.s32.totalorder %v955_v7, 113 }
   0xe   : > { %s813_s29 = sshll.u32 %s1187_s28, 3  ;;  %vm470_vm8 = vcmp.lt.s32.totalorder %v955_v7, 111  ;;  %vm538_vm9 = vcmask 1041408   ;;  %vm534_vm10 = vcmask 293888   ;;  %s814_s9 = sshll.u32 %s1187_s28, 4 }
   0xf   : > { %s300_s10 = scalar_lea.vmem %s1177_s0, %s813_s29 }
  0x10   : > { %v911_v0 = vld [vmem:[%s300_s10] sm:$0xff] }
  0x11   : > { %378 = vrot.lane.b32.xlu1 %v911_v0, %s843_s11  ;;  %334 = vrot.lane.b32.xlu0 %v911_v0, %s844_s12  ;;  %v919_v1 = vcombine.high %v911_v0, %v911_v0 }
  0x15   : > { %311 = vrot.lane.b32.xlu0 %v911_v0, %s845_s13  ;;  %380 = vrot.lane.b32.xlu1 %v919_v1, %s843_s11 }
  0x19   : > { %313 = vrot.lane.b32.xlu1 %v919_v1, %s845_s13  ;;  %336 = vrot.lane.b32.xlu0 %v919_v1, %s844_s12 }
  0x1d   : > { %358 = vrot.lane.b32.xlu1 %v919_v1, %s846_s14  ;;  %356 = vrot.lane.b32.xlu0 %v911_v0, %s846_s14 }
  0x21   : > { %402 = vrot.lane.b32.xlu1 %v919_v1, %s847_s15  ;;  %400 = vrot.lane.b32.xlu0 %v911_v0, %s847_s15 }
  0x25   : > { %446 = vrot.lane.b32.xlu1 %v919_v1, %s848_s16  ;;  %444 = vrot.lane.b32.xlu0 %v911_v0, %s848_s16 }
  0x29   : > { %424 = vrot.lane.b32.xlu1 %v919_v1, %s850_s17  ;;  %422 = vrot.lane.b32.xlu0 %v911_v0, %s850_s17 }
  0x2d   : > { %468 = vrot.lane.b32.xlu1 %v919_v1, %s851_s18  ;;  %466 = vrot.lane.b32.xlu0 %v911_v0, %s851_s18 }
  0x31   : > { %531 = vperm.xlu0 %832, %v528_v3   ;;  %v461_v3 = vrot.slane %v791_v53, %v959_v11 }
  0x35   : > { %697 = vperm.xlu0 %832, %v694_v4   ;;  %v790_v4 = vld [vmem:[%s1184_s7 + $0xc] sm:$0x3] }
  0x83   : > { %v379_v8 = vpop.permute.xlu1 %378  ;;  %v335_v9 = vpop.permute.xlu0 %334 }
  0x87   : > { %v312_v14 = vpop.permute.xlu0 %311  ;;  %v381_v15 = vpop.permute.xlu1 %380 }
  0x88   : > { %v383_v19 = vsel %vm382_vm0, %v379_v8, %v381_v15  ;;  %v384_v20 = vsel %vm382_vm0, %v381_v15, %v379_v8 }
  0x89   : > { %v398_v28 = vmul.f32 %v391_v16, %v384_v20  ;;  %v399_v29 = vmul.f32 %v395_v17, %v383_v19  ;;  %v435_v16 = vrot.slane %v790_v4, %v957_v10  ;;  %v439_v17 = vrot.slane %v790_v4, %v959_v11 }
  0x8b   : > { %v314_v26 = vpop.permute.xlu1 %313  ;;  %v337_v27 = vpop.permute.xlu0 %336  ;;  %v496_v43 = vrot.slane %v398_v28, 4  ;;  %v497_v44 = vrot.slane %v399_v29, 4 }
  0x8c   : > { %v339_v30 = vsel %vm338_vm1, %v335_v9, %v337_v27  ;;  %v340_v31 = vsel %vm338_vm1, %v337_v27, %v335_v9  ;;  %v318_v36 = vsel %vm317_vm2, %v312_v14, %v314_v26  ;;  %v319_v37 = vsel %vm317_vm2, %v314_v26, %v312_v14 }
  0x8d   : > { %v354_v32 = vmul.f32 %v347_v21, %v340_v31  ;;  %v355_v33 = vmul.f32 %v351_v22, %v339_v30  ;;  %v332_v47 = vmul.f32 %v325_v24, %v319_v37  ;;  %v333_v48 = vmul.f32 %v329_v25, %v318_v36 }
  0x8e   : > { %v479_v25 = vrot.slane %v792_v18, %v957_v10  ;;  %v483_v26 = vrot.slane %v792_v18, %v959_v11  ;;  %v799_v18 = vld [vmem:[%s1180_s3 + $0x20] sm:$0xff] }
  0x8f   : > { %v490_v38 = vrot.slane %v354_v32, 4  ;;  %v491_v39 = vrot.slane %v355_v33, 4  ;;  %v359_v40 = vpop.permute.xlu1 %358  ;;  %v357_v41 = vpop.permute.xlu0 %356 }
  0x90   : > { %v361_v45 = vsel %vm360_vm3, %v357_v41, %v359_v40  ;;  %v362_v46 = vsel %vm360_vm3, %v359_v40, %v357_v41 }
  0x91   : > { %v376_v49 = vmul.f32 %v369_v34, %v362_v46  ;;  %v377_v50 = vmul.f32 %v373_v35, %v361_v45  ;;  %v514_v56 = vsel %vm512_vm5, %v333_v48, %v491_v39  ;;  %v513_v58 = vsel %vm512_vm5, %v332_v47, %v490_v38 }
  0x93   : > { %v403_v54 = vpop.permute.xlu1 %402  ;;  %v401_v55 = vpop.permute.xlu0 %400  ;;  %v516_v57 = vsel %vm512_vm5, %v377_v50, %v497_v44  ;;  %v515_v59 = vsel %vm512_vm5, %v376_v49, %v496_v43  ;;  %v710_v50 = vld [vmem:[%s1183_s6] sm:$0xff] }
  0x94   : > { %v405_v60 = vsel %vm404_vm4, %v401_v55, %v403_v54  ;;  %v406_v61 = vsel %vm404_vm4, %v403_v54, %v401_v55  ;;  %v523_v62 = vpack.c.bf16 %v516_v57, %v514_v56  ;;  %v522_v63 = vpack.c.bf16 %v515_v59, %v513_v58 }
  0x95   : > { %v420_v5 = vmul.f32 %v413_v51, %v405_v60  ;;  %v421_v6 = vmul.f32 %v417_v52, %v406_v61  ;;  %v702_v51 = vld [vmem:[%s1182_s5] sm:$0xff] }
  0x96   : > { %545 = vmatprep.subr.bf16.mxu0 %v523_v62 }
  0x97   : > { %v447_v8 = vpop.permute.xlu1 %446  ;;  %546 = vmatpush1.bf16.msra.mxu0 %v522_v63  ;;  %v445_v9 = vpop.permute.xlu0 %444  ;;  %v502_v19 = vrot.slane %v420_v5, 4  ;;  %v503_v20 = vrot.slane %v421_v6, 4  ;;  %v597_v63 = vld [vmem:[%s1180_s3] sm:$0xff]  ;;  %v796_v6 = vld [vmem:[%s1180_s3 + $0x48] sm:$0xff] }
  0x98   : > { %v449_v12 = vsel %vm448_vm6, %v445_v9, %v447_v8  ;;  %v450_v13 = vsel %vm448_vm6, %v447_v8, %v445_v9  ;;  %v795_v5 = vld [vmem:[%s1180_s3 + $0x40] sm:$0xff]  ;;  %v797_v8 = vld [vmem:[%s1180_s3 + $0x10] sm:$0xff]  ;;  %v798_v9 = vld [vmem:[%s1180_s3 + $0x18] sm:$0xff] }
  0x99   : > { %v464_v14 = vmul.f32 %v457_v2, %v449_v12  ;;  %v465_v15 = vmul.f32 %v461_v3, %v450_v13  ;;  %v518_v33 = vsel %vm512_vm5, %v919_v1, %v503_v20  ;;  %v517_v35 = vsel %vm512_vm5, %v911_v0, %v502_v19  ;;  %v521_v0 = vld [vmem:[%s1178_s1] sm:$0xf]  ;;  %v598_v2 = vld [vmem:[%s1180_s3 + $0x8] sm:$0xff] }
  0x9a   : > { %v800_v19 = vld [vmem:[%s1180_s3 + $0x28] sm:$0xff] }
  0x9b   : > { %v425_v21 = vpop.permute.xlu1 %424  ;;  %v423_v22 = vpop.permute.xlu0 %422  ;;  %v508_v27 = vrot.slane %v464_v14, 4  ;;  %v509_v28 = vrot.slane %v465_v15, 4 }
  0x9c   : > { %v427_v23 = vsel %vm426_vm7, %v423_v22, %v425_v21  ;;  %v428_v24 = vsel %vm426_vm7, %v425_v21, %v423_v22 }
  0x9d   : > { %v442_v29 = vmul.f32 %v435_v16, %v427_v23  ;;  %v443_v30 = vmul.f32 %v439_v17, %v428_v24 }
  0x9f   : > { %v469_v31 = vpop.permute.xlu1 %468  ;;  %v467_v32 = vpop.permute.xlu0 %466  ;;  %v520_v34 = vsel %vm512_vm5, %v443_v30, %v509_v28  ;;  %v519_v36 = vsel %vm512_vm5, %v442_v29, %v508_v27  ;;  %v802_v27 = vld [vmem:[%s1180_s3 + $0x38] sm:$0xff] }
  0xa0   : > { %v471_v10 = vsel %vm470_vm8, %v467_v32, %v469_v31  ;;  %v472_v11 = vsel %vm470_vm8, %v469_v31, %v467_v32  ;;  %v525_v37 = vpack.c.bf16 %v520_v34, %v518_v33  ;;  %v524_v38 = vpack.c.bf16 %v519_v36, %v517_v35  ;;  %v803_v35 = vld [vmem:[%s1180_s3 + $0x50] sm:$0xff]  ;;  %v804_v36 = vld [vmem:[%s1180_s3 + $0x58] sm:$0xff] }
  0xa1   : > { %v486_v39 = vmul.f32 %v479_v25, %v471_v10  ;;  %v487_v40 = vmul.f32 %v483_v26, %v472_v11  ;;  %v801_v26 = vld [vmem:[%s1180_s3 + $0x30] sm:$0xff] }
  0xa2   : > { %547 = vmatprep.subr.bf16.mxu0 %v525_v37 }
  0xa3   : > { %v526_v1 = vpack.c.bf16 %v486_v39, %v486_v39  ;;  %v527_v41 = vpack.c.bf16 %v487_v40, %v487_v40  ;;  %548 = vmatpush1.bf16.msra.mxu0 %v524_v38 }
  0xa5   : > { %793 = vmatprep.subr.msk.bf16.mxu0 %vm538_vm9, %v527_v41  ;;  %v540_v42 = vsel %vm538_vm9, %v526_v1, 0  ;;  %v805_v41 = vld [vmem:[%s1180_s3 + $0x60] sm:$0xff] }
  0xa7   : > { %550 = vmatpush1.bf16.msra.mxu0 %v540_v42  ;;  %v806_v42 = vld [vmem:[%s1180_s3 + $0x68] sm:$0xff] }
  0xaa   : > { %794 = vmatmul.mubr.msk.bf16.vlgmr.msra.gmra.mrb[0].mxu0 %vm534_vm10, %v521_v0 }
  0xb0   : > { %v532_v43 = vpop.permute.xlu0 %531 }
  0xb4   : > { %v1076_v52 = vpop.permute.xlu0 %697 }
 0x17d   : > { %v579_v44 = vpop.f32.mrb[0].mxu0 }
 0x17e   : > { %v580_v45 = vadd.f32 %v579_v44, %v532_v43  ;;  %v581_v46 = vpop.f32.mrb[1].mxu0 }
 0x17f   : > { %v583_v47 = vpop.f32.mrb[2].mxu0  ;;  %v582_v49 = vadd.f32 %v581_v46, %v532_v43 }
 0x180   : > { %v584_v48 = vpop.f32.mrb[3].mxu0  ;;  %603 = vrot.lane.b32.xlu0 %v580_v45, %s844_s12  ;;  %591 = vrot.lane.b32.xlu1 %v580_v45, %s845_s13  ;;  %v589_v23 = vmul.f32 %v795_v5, %v580_v45  ;;  %v810_v5 = vld [vmem:[%s1180_s3 + $0x88] sm:$0xff] }
 0x181   : > { %v590_v22 = vmul.f32 %v796_v6, %v582_v49 }
 0x184   : > { %616 = vrot.lane.b32.xlu0 %v580_v45, %s846_s14  ;;  %681 = vrot.lane.b32.xlu1 %v580_v45, %s851_s18 }
 0x188   : > { %629 = vrot.lane.b32.xlu0 %v580_v45, %s843_s11  ;;  %593 = vrot.lane.b32.xlu1 %v582_v49, %s845_s13  ;;  %s305_s13 = scalar_lea.vmem %s1185_s8, %s814_s9 }
 0x18c   : > { %642 = vrot.lane.b32.xlu0 %v580_v45, %s847_s15  ;;  %605 = vrot.lane.b32.xlu1 %v582_v49, %s844_s12 }
 0x190   : > { %655 = vrot.lane.b32.xlu0 %v580_v45, %s850_s17  ;;  %618 = vrot.lane.b32.xlu1 %v582_v49, %s846_s14 }
 0x194   : > { %668 = vrot.lane.b32.xlu0 %v580_v45, %s848_s16  ;;  %631 = vrot.lane.b32.xlu1 %v582_v49, %s843_s11 }
 0x198   : > { %683 = vrot.lane.b32.xlu0 %v582_v49, %s851_s18  ;;  %644 = vrot.lane.b32.xlu1 %v582_v49, %s847_s15 }
 0x19c   : > { %713 = vperm.xlu0 %832, %v710_v50   ;;  %657 = vrot.lane.b32.xlu1 %v582_v49, %s850_s17  ;;  %v808_v50 = vld [vmem:[%s1180_s3 + $0x78] sm:$0xff] }
 0x1a0   : > { %670 = vrot.lane.b32.xlu1 %v582_v49, %s848_s16  ;;  %v807_v49 = vld [vmem:[%s1180_s3 + $0x70] sm:$0xff] }
 0x1a4   : > { %705 = vperm.xlu1 %833, %v702_v51  }
 0x1f2   : > { %v592_v53 = vpop.permute.xlu1 %591  ;;  %v604_v54 = vpop.permute.xlu0 %603 }
 0x1f6   : > { %v1078_v55 = vpop.permute.xlu1 %681  ;;  %v617_v56 = vpop.permute.xlu0 %616 }
 0x1fa   : > { %v594_v57 = vpop.permute.xlu1 %593  ;;  %v630_v58 = vpop.permute.xlu0 %629 }
 0x1fb   : > { %v595_v3 = vsel %vm317_vm2, %v592_v53, %v594_v57  ;;  %v596_v4 = vsel %vm317_vm2, %v594_v57, %v592_v53 }
 0x1fc   : > { %v599_v14 = vmul.f32 %v597_v63, %v596_v4  ;;  %v600_v15 = vmul.f32 %v598_v2, %v595_v3  ;;  %v809_v4 = vld [vmem:[%s1180_s3 + $0x80] sm:$0xff] }
 0x1fe   : > { %v606_v59 = vpop.permute.xlu1 %605  ;;  %v643_v61 = vpop.permute.xlu0 %642  ;;  %v601_v30 = vadd.f32 %v599_v14, %v589_v23  ;;  %v602_v31 = vadd.f32 %v600_v15, %v590_v22 }
 0x1ff   : > { %v607_v12 = vsel %vm338_vm1, %v604_v54, %v606_v59  ;;  %v608_v13 = vsel %vm338_vm1, %v606_v59, %v604_v54 }
 0x200   : > { %v612_v24 = vmul.f32 %v797_v8, %v608_v13  ;;  %v613_v25 = vmul.f32 %v798_v9, %v607_v12 }
 0x202   : > { %v619_v60 = vpop.permute.xlu1 %618  ;;  %v656_v16 = vpop.permute.xlu0 %655  ;;  %v614_v37 = vadd.f32 %v612_v24, %v601_v30  ;;  %v615_v38 = vadd.f32 %v613_v25, %v602_v31 }
 0x203   : > { %v620_v20 = vsel %vm360_vm3, %v617_v56, %v619_v60  ;;  %v621_v21 = vsel %vm360_vm3, %v619_v60, %v617_v56 }
 0x204   : > { %v625_v32 = vmul.f32 %v799_v18, %v621_v21  ;;  %v626_v33 = vmul.f32 %v800_v19, %v620_v20 }
 0x206   : > { %v632_v62 = vpop.permute.xlu1 %631  ;;  %v669_v1 = vpop.permute.xlu0 %668  ;;  %v627_v44 = vadd.f32 %v625_v32, %v614_v37  ;;  %v628_v45 = vadd.f32 %v626_v33, %v615_v38 }
 0x207   : > { %v633_v28 = vsel %vm382_vm0, %v630_v58, %v632_v62  ;;  %v634_v29 = vsel %vm382_vm0, %v632_v62, %v630_v58 }
 0x208   : > { %v638_v39 = vmul.f32 %v801_v26, %v634_v29  ;;  %v639_v40 = vmul.f32 %v802_v27, %v633_v28 }
 0x20a   : > { %v645_v17 = vpop.permute.xlu1 %644  ;;  %v640_v54 = vadd.f32 %v638_v39, %v627_v44  ;;  %v641_v56 = vadd.f32 %v639_v40, %v628_v45 }
 0x20b   : > { %v646_v10 = vsel %vm404_vm4, %v643_v61, %v645_v17  ;;  %v647_v11 = vsel %vm404_vm4, %v645_v17, %v643_v61  ;;  %v684_v61 = vpop.permute.xlu0 %683 }
 0x20c   : > { %v651_v46 = vmul.f32 %v803_v35, %v646_v10  ;;  %v652_v47 = vmul.f32 %v804_v36, %v647_v11  ;;  %v685_v6 = vsel %vm470_vm8, %v1078_v55, %v684_v61  ;;  %v686_v8 = vsel %vm470_vm8, %v684_v61, %v1078_v55 }
 0x20d   : > { %v690_v13 = vmul.f32 %v809_v4, %v685_v6  ;;  %v691_v14 = vmul.f32 %v810_v5, %v686_v8 }
 0x20e   : > { %v658_v34 = vpop.permute.xlu1 %657  ;;  %v653_v59 = vadd.f32 %v651_v46, %v640_v54  ;;  %v654_v60 = vadd.f32 %v652_v47, %v641_v56 }
 0x20f   : > { %v659_v0 = vsel %vm426_vm7, %v656_v16, %v658_v34  ;;  %v660_v43 = vsel %vm426_vm7, %v658_v34, %v656_v16 }
 0x210   : > { %v664_v57 = vmul.f32 %v805_v41, %v659_v0  ;;  %v665_v58 = vmul.f32 %v806_v42, %v660_v43 }
 0x212   : > { %v671_v48 = vpop.permute.xlu1 %670  ;;  %v666_v2 = vadd.f32 %v664_v57, %v653_v59  ;;  %v667_v3 = vadd.f32 %v665_v58, %v654_v60 }
 0x213   : > { %v672_v51 = vsel %vm448_vm6, %v669_v1, %v671_v48  ;;  %v673_v53 = vsel %vm448_vm6, %v671_v48, %v669_v1 }
 0x214   : > { %v677_v62 = vmul.f32 %v807_v49, %v672_v51  ;;  %v678_v63 = vmul.f32 %v808_v50, %v673_v53 }
 0x216   : > { %v679_v9 = vadd.f32 %v677_v62, %v666_v2  ;;  %v680_v12 = vadd.f32 %v678_v63, %v667_v3 }
 0x218   : > { %v692_v15 = vadd.f32 %v690_v13, %v679_v9  ;;  %v693_v16 = vadd.f32 %v691_v14, %v680_v12 }
 0x21a   : > { %v700_v17 = vadd.f32 %v1076_v52, %v692_v15  ;;  %v701_v18 = vadd.f32 %v1076_v52, %v693_v16 }
 0x21b   : > { %v714_v22 = vpop.permute.xlu0 %713 }
 0x223   : > { %v706_v19 = vpop.permute.xlu1 %705 }
 0x224   : > { %v708_v20 = vmul.f32 %v706_v19, %v700_v17  ;;  %v709_v21 = vmul.f32 %v706_v19, %v701_v18 }
 0x226   : > { %v716_v23 = vadd.f32 %v714_v22, %v708_v20  ;;  %v717_v24 = vadd.f32 %v714_v22, %v709_v21 }
 0x228   : > { %v718_v7 = vmax.f32 %v716_v23, 0.0  ;;  %v719_v55 = vmax.f32 %v717_v24, 0.0 }
 0x22a   : > { %720 = vst [vmem:[%s305_s13] sm:$0xff] %v718_v7  ;;  %721 = vst [vmem:[%s305_s13 + $0x8] sm:$0xff] %v719_v55 }
 0x22b PF: > { %s18_s27 = sadd.s32 1, %s841_s27  }
 0x22c   : > { %p15_p4 = scmp.ge.s32.totalorder %s18_s27, 4  }
 0x22e   :  { %17 = sbr.rel (!%p15_p4) target bundleno = 1 (0x1), region = 97 }

</bundles_post_ra>
